<compile_context>
chip_gen: v6e
topology: v6e:2x2x1
jax: 0.10.0
libtpu: 0.0.40
codegen_flags: <defaults>
</compile_context>

<pallas_src>
import functools

import jax
import jax.numpy as jnp
from jax.experimental import pallas as pl
from jax.experimental.pallas import tpu as pltpu


def _layernorm_kernel(x_ref, g_ref, b_ref, o_ref, *, eps, fused_fn):
    # x_ref: (row_tile, D) tile of rows; g_ref/b_ref: (1, D) f32 affine params.
    x = x_ref[...].astype(jnp.float32)
    mean = jnp.mean(x, axis=-1, keepdims=True)
    xc = x - mean
    var = jnp.mean(xc * xc, axis=-1, keepdims=True)  # biased, matches nn.LayerNorm
    y = xc * jax.lax.rsqrt(var + eps)                # rsqrt -> EUP slot
    y = y * g_ref[...] + b_ref[...]
    if fused_fn is not None:
        y = fused_fn(y)  # elementwise-only fusion of the wrapped fn
    o_ref[...] = y.astype(o_ref.dtype)


def _round_up(x, m):
    return ((x + m - 1) // m) * m


def _pick_tiling(rows, dim, dtype_bytes):
    """Pick (row_tile, vmem_limit_bytes) from the chip's VMEM capacity."""
    # Sublane packing multiple: 8 rows (f32), 16 (bf16), 32 (int8/fp8).
    sub = {4: 8, 2: 16, 1: 32}.get(dtype_bytes, 8)
    try:
        info = pltpu.get_tpu_info()
        vmem_cap = int(getattr(info, "vmem_capacity_bytes", 64 * 2**20))
    except Exception:
        vmem_cap = 64 * 2**20  # conservative fallback (v7x per-TC VMEM)

    # Budget ~1/4 of physical VMEM for pipeline buffers: double-buffered in +
    # out blocks (4 * dtype_bytes / elem) plus ~2 f32 temporaries per element.
    budget = vmem_cap // 4
    per_row_bytes = dim * (4 * dtype_bytes + 8)
    rt = budget // max(per_row_bytes, 1)
    # Keep the grid at least ~8 steps so both TCs stay busy and the pipeline
    # has work; never below one sublane group; hard cap at 1024 rows/block.
    rt = min(rt, max(sub, _round_up(pl.cdiv(rows, 8), sub)))
    rt = min(rt, 1024)
    rt = max(sub, (rt // sub) * sub)

    vmem_limit = int(min(vmem_cap * 3 // 4, 96 * 2**20))
    return int(rt), vmem_limit


@functools.lru_cache(maxsize=None)
def _build_layernorm_call(rows, dim, in_dtype, out_dtype, row_tile, eps,
                          fused_fn, vmem_limit):
    """Build (and cache) the jitted pallas_call for one static configuration."""
    dtype_bytes = jnp.dtype(in_dtype).itemsize
    grid = (pl.cdiv(rows, row_tile),)
    cost = pl.CostEstimate(
        flops=7 * rows * dim,
        transcendentals=rows,
        bytes_accessed=2 * rows * dim * dtype_bytes + 2 * dim * 4,
    )
    kernel = functools.partial(_layernorm_kernel, eps=eps, fused_fn=fused_fn)

    call = pl.pallas_call(
        kernel,
        out_shape=jax.ShapeDtypeStruct((rows, dim), jnp.dtype(out_dtype)),
        grid_spec=pltpu.PrefetchScalarGridSpec(
            num_scalar_prefetch=0,
            grid=grid,
            in_specs=[
                pl.BlockSpec((row_tile, dim), lambda i: (i, 0)),
                pl.BlockSpec((1, dim), lambda i: (0, 0)),
                pl.BlockSpec((1, dim), lambda i: (0, 0)),
            ],
            out_specs=pl.BlockSpec((row_tile, dim), lambda i: (i, 0)),
        ),
        compiler_params=pltpu.CompilerParams(
            dimension_semantics=("parallel",),
            vmem_limit_bytes=vmem_limit,
        ),
        cost_estimate=cost,
    )
    return jax.jit(call)


def layernorm_pallas(x, gamma2d, beta2d, *, eps=1e-5, row_tile=None,
                     fused_fn=None):
    """LayerNorm over the last axis of x using a Pallas TPU kernel.

    gamma2d / beta2d must be (1, dim) float32. If `fused_fn` is given it must
    be an elementwise function of the normalized tensor; it is traced into the
    kernel body (saves an HBM round trip).
    """
    orig_shape = x.shape
    dim = orig_shape[-1]
    x2 = x.reshape(-1, dim)
    rows = x2.shape[0]

    dtype_bytes = jnp.dtype(x2.dtype).itemsize
    auto_tile, vmem_limit = _pick_tiling(rows, dim, dtype_bytes)
    if row_tile is None:
        row_tile = auto_tile

    # TODO(synk): if `dim` < 128, lanes are partially idle; packing multiple
    # rows per vreg row needs segmented per-row reductions and is not done.
    call = _build_layernorm_call(
        int(rows), int(dim), str(jnp.dtype(x2.dtype)), str(jnp.dtype(x.dtype)),
        int(row_tile), float(eps), fused_fn, int(vmem_limit),
    )
    out = call(x2, gamma2d, beta2d)
    return out.reshape(orig_shape)


class PreNorm:
    """JAX/Pallas port of timesformer_pytorch PreNorm.

    norm = nn.LayerNorm(dim)  ->  gamma=ones(dim), beta=zeros(dim), eps=1e-5
    forward(x, *args, **kwargs) = fn(LayerNorm(x), *args, **kwargs)

    If `fuse_elementwise=True` and fn takes no extra args, fn is assumed to be
    elementwise and is fused into the LayerNorm kernel (same semantics, one
    fewer HBM round trip). Otherwise fn runs in plain JAX after the kernel.
    """

    def __init__(self, dim, fn, fuse_elementwise=False):
        self.dim = dim
        self.fn = fn
        self.fuse_elementwise = fuse_elementwise
        # nn.LayerNorm default init: weight=1, bias=0 (deterministic).
        # Stored once as (1, dim) f32 — the layout the kernel consumes.
        self.gamma = jnp.ones((1, dim), jnp.float32)
        self.beta = jnp.zeros((1, dim), jnp.float32)
        self.eps = 1e-5

    def __call__(self, x, *args, **kwargs):
        fused = self.fn if (self.fuse_elementwise and not args and not kwargs) else None
        y = layernorm_pallas(x, self.gamma, self.beta, eps=self.eps, fused_fn=fused)
        if fused is not None:
            return y
        return self.fn(y, *args, **kwargs)


if __name__ == "__main__":
    key = jax.random.PRNGKey(0)
    batch, seq, dim = 2, 8, 32
    x = jax.random.normal(key, (batch, seq, dim), dtype=jnp.float32)

    # Example wrapped fn: a simple elementwise op (PreNorm wraps arbitrary fn).
    fn = lambda y: y * 2.0 + 1.0

    def ref_prenorm(xx, gamma, beta):
        mean = jnp.mean(xx, axis=-1, keepdims=True)
        var = jnp.mean((xx - mean) ** 2, axis=-1, keepdims=True)
        g = gamma.reshape(-1)
        b = beta.reshape(-1)
        return fn((xx - mean) * jax.lax.rsqrt(var + 1e-5) * g + b)

    # Generic path: fn applied in plain JAX after the Pallas LayerNorm.
    m1 = PreNorm(dim, fn, fuse_elementwise=False)
    out1 = jax.block_until_ready(m1(x))
    assert out1.shape == x.shape
    assert jnp.max(jnp.abs(out1 - ref_prenorm(x, m1.gamma, m1.beta))) < 1e-4

    # Fused path: elementwise fn traced into the kernel.
    m2 = PreNorm(dim, fn, fuse_elementwise=True)
    out2 = jax.block_until_ready(m2(x))
    assert jnp.max(jnp.abs(out2 - ref_prenorm(x, m2.gamma, m2.beta))) < 1e-4

    # Repeated call with identical shapes: hits the cached, jitted pallas_call.
    out2b = jax.block_until_ready(m2(x))
    assert jnp.max(jnp.abs(out2b - out2)) == 0.0

    # Ragged row count (rows not a multiple of the row tile) exercises the
    # pl.cdiv grid / masked last block (no host-side padding copy).
    x3 = jax.random.normal(jax.random.PRNGKey(0), (3, 5, dim), dtype=jnp.float32)
    out3 = jax.block_until_ready(m2(x3))
    assert out3.shape == x3.shape
    assert jnp.max(jnp.abs(out3 - ref_prenorm(x3, m2.gamma, m2.beta))) < 1e-4

    print("KERNEL_OK")
</pallas_src>

<mosaic_0001>
module attributes {stable_mosaic.version = 11 : i64} {
  func.func @_layernorm_kernel(%arg0: i32, %arg1: memref<8x32xf32, #tpu.memory_space<vmem>>, %arg2: memref<1x32xf32, #tpu.memory_space<vmem>>, %arg3: memref<1x32xf32, #tpu.memory_space<vmem>>, %arg4: memref<8x32xf32, #tpu.memory_space<vmem>>) attributes {dimension_semantics = [#tpu.dimension_semantics<parallel>], iteration_bounds = array<i64: 2>, scalar_prefetch = 0 : i64, scratch_operands = 0 : i64, tpu.core_type = #tpu.core_type<tc>, window_params = [{transform_indices = @transform_0, window_bounds = array<i64: 8, 32>}, {pipeline_mode = #tpu.pipeline_mode<synchronous>, transform_indices = @transform_1, window_bounds = array<i64: 1, 32>}, {pipeline_mode = #tpu.pipeline_mode<synchronous>, transform_indices = @transform_2, window_bounds = array<i64: 1, 32>}, {transform_indices = @transform_3, window_bounds = array<i64: 8, 32>}]} {
    %c0 = arith.constant 0 : index
    %c0_0 = arith.constant 0 : index
    %0 = vector.load %arg1[%c0, %c0_0] : memref<8x32xf32, #tpu.memory_space<vmem>>, vector<8x32xf32>
    %cst = arith.constant dense<0.000000e+00> : vector<8xf32>
    %1 = vector.multi_reduction <add>, %0, %cst [1] : vector<8x32xf32> to vector<8xf32>
    %2 = vector.shape_cast %1 : vector<8xf32> to vector<8x1xf32>
    %cst_1 = arith.constant 3.200000e+01 : f32
    %3 = vector.broadcast %cst_1 : f32 to vector<8x1xf32>
    %4 = arith.divf %2, %3 : vector<8x1xf32>
    %5 = vector.broadcast %4 : vector<8x1xf32> to vector<8x32xf32>
    %6 = arith.subf %0, %5 : vector<8x32xf32>
    %7 = arith.mulf %6, %6 : vector<8x32xf32>
    %cst_2 = arith.constant dense<0.000000e+00> : vector<8xf32>
    %8 = vector.multi_reduction <add>, %7, %cst_2 [1] : vector<8x32xf32> to vector<8xf32>
    %9 = vector.shape_cast %8 : vector<8xf32> to vector<8x1xf32>
    %cst_3 = arith.constant 3.200000e+01 : f32
    %10 = vector.broadcast %cst_3 : f32 to vector<8x1xf32>
    %11 = arith.divf %9, %10 : vector<8x1xf32>
    %cst_4 = arith.constant 9.99999974E-6 : f32
    %12 = vector.broadcast %cst_4 : f32 to vector<8x1xf32>
    %13 = arith.addf %11, %12 : vector<8x1xf32>
    %14 = math.rsqrt %13 : vector<8x1xf32>
    %15 = vector.broadcast %14 : vector<8x1xf32> to vector<8x32xf32>
    %16 = arith.mulf %6, %15 : vector<8x32xf32>
    %c0_5 = arith.constant 0 : index
    %c0_6 = arith.constant 0 : index
    %17 = vector.load %arg2[%c0_5, %c0_6] : memref<1x32xf32, #tpu.memory_space<vmem>>, vector<1x32xf32>
    %18 = vector.broadcast %17 : vector<1x32xf32> to vector<8x32xf32>
    %19 = arith.mulf %16, %18 : vector<8x32xf32>
    %c0_7 = arith.constant 0 : index
    %c0_8 = arith.constant 0 : index
    %20 = vector.load %arg3[%c0_7, %c0_8] : memref<1x32xf32, #tpu.memory_space<vmem>>, vector<1x32xf32>
    %21 = vector.broadcast %20 : vector<1x32xf32> to vector<8x32xf32>
    %22 = arith.addf %19, %21 : vector<8x32xf32>
    %c0_9 = arith.constant 0 : index
    %c0_10 = arith.constant 0 : index
    %23 = vector.load %arg4[%c0_9, %c0_10] : memref<8x32xf32, #tpu.memory_space<vmem>>, vector<8x32xf32>
    tpu.vector_store %arg4[%c0_9, %c0_10], %22 {strides = array<i32>} : memref<8x32xf32, #tpu.memory_space<vmem>>, vector<8x32xf32>,
    return
  }
  func.func @transform_0(%arg0: i32) -> (i32, i32) {
    %c0_i32 = arith.constant 0 : i32
    %c0_i32_0 = arith.constant 0 : i32
    return %arg0, %c0_i32 : i32, i32
  }
  func.func @transform_1(%arg0: i32) -> (i32, i32) {
    %c0_i32 = arith.constant 0 : i32
    %c0_i32_0 = arith.constant 0 : i32
    %c0_i32_1 = arith.constant 0 : i32
    return %c0_i32, %c0_i32_0 : i32, i32
  }
  func.func @transform_2(%arg0: i32) -> (i32, i32) {
    %c0_i32 = arith.constant 0 : i32
    %c0_i32_0 = arith.constant 0 : i32
    %c0_i32_1 = arith.constant 0 : i32
    return %c0_i32, %c0_i32_0 : i32, i32
  }
  func.func @transform_3(%arg0: i32) -> (i32, i32) {
    %c0_i32 = arith.constant 0 : i32
    %c0_i32_0 = arith.constant 0 : i32
    return %arg0, %c0_i32 : i32, i32
  }
}

</mosaic_0001>

<bundles_post_ra>
// kernel: tpu_custom_call.1
= control target key start
LH: loop header
LB: loop body
LE: loop exit
PB: predicated region body
PF: predicated region fallthrough
CT: control target
= control target key end

     0   :  { %8 = vsyncpa [#allocation3], 0  ;;  %s631_s0 = inlined_call_operand.hbm [shape: f32[16,32], index: 0, kind: input, shape index: {}]   ;;  %s632_s1 = inlined_call_operand.vmem [shape: f32[1,32], index: 1, kind: input, shape index: {}]   ;;  %s633_s2 = inlined_call_operand.vmem [shape: f32[1,32], index: 2, kind: input, shape index: {}]   ;;  %s634_s3 = inlined_call_operand.hbm [shape: f32[16,32], index: 3, kind: output, shape index: {}]  }
   0x1   :  { %10 = vsyncpa [#allocation3 + $0x1], 0 }
   0x2   :  { %11 = vsyncpa [#allocation4], 0 }
   0x3   :  { %13 = vsyncpa [#allocation4 + $0x1], 0  ;;  %s481_s12 = smov 0   ;;  %s483_s13 = smov 0  }
   0x4   :  { %s485_s14 = smov 0   ;;  %s487_s15 = smov 0  }
   0x5 LB: > { %s502_s16 = sadd.s32 4294967295, %s457_s15   ;;  %s303_s17 = sadd.s32 4294967294, %s457_s15   ;;  %s457_s15 = sphi %s487_s15, %s651_s15   ;;  %s453_s14 = sphi %s485_s14, %s650_s14   ;;  %s449_s13 = sphi %s483_s13, %s649_s13   ;;  %s445_s12 = sphi %s481_s12, %s648_s12  }
   0x6   : > { %s506_s18 = sadd.s32 1, %s457_s15   ;;  %s26_s19 = sadd.s32 1, %s453_s14 }
   0x7   : > { %s23_s20 = ssub.s32 %s457_s15, %s506_s18  ;;  %p33_p0 = scmp.ne.s32.totalorder %s453_s14, %s449_s13 }
   0x8   : > { %p24_p1 = scmp.eq.s32.totalorder %s23_s20, 0  ;;  %p34_p2 = scmp.eq.s32.totalorder %s457_s15, 0 }
   0x9   : > { %p39_p3 = scmp.ne.s32.totalorder %s449_s13, %s445_s12  ;;  %p40_p4 = scmp.eq.s32.totalorder %s502_s16, 0 }
   0xa   : > { %s518_s21 = scalar_select %p24_p1, %s453_s14, %s26_s19  }
   0xb   : > { %p520_p5 = por %p34_p2, %p33_p0  ;;  %p524_p6 = por %p40_p4, %p39_p3 }
   0xc   : > { %p105_p7 = scmp.eq.s32.totalorder %s502_s16, 1  ;;  %p111_p8 = scmp.eq.s32.totalorder %s303_s17, 1 }
   0xd   : > { %s638_s23 = scalar_select %p524_p6, 1, 0 }
   0xe   : > { %p329_p10 = scmp.lt.s32.totalorder %s457_s15, 2  ;;  %p531_p11 = por %p105_p7, %p33_p0 }
   0xf   : > { %p535_p12 = por %p111_p8, %p39_p3  ;;  %s137_s26 = sand.u32 1, %s453_s14  }
  0x10   : > { %s639_s24 = scalar_select %p531_p11, 1, 0 }
  0x11   : > { %s640_s25 = scalar_select %p535_p12, 1, 0 }
  0x12   : > { %s307_s27 = sshll.u32 %s457_s15, 7  ;;  %s306_s28 = sshll.u32 %s137_s26, 3 }
  0x13   : > { %s544_s4 = scalar_lea.hbm %s631_s0, %s307_s27  ;;  %s141_s5 = scalar_lea.vmem [#allocation2], %s306_s28 }
  0x14   : > { %s148_s6 = sshll.u32 %s141_s5, 4  ;;  %p548_p13 = pnand %p329_p10, %p520_p5  ;;  %s552_s6 = int_to_ptr.vmem [resolvable:$true] %s148_s6 }
  0x15   : > { %s138_s8 = scalar_lea.sflag [#allocation3], %s137_s26  ;;  %s365_s9 = scalar_lea.hbm %s544_s4, 128 }
  0x16   : > { %p366_p2 = scmp.ne.s32.totalorder %s544_s4, %s365_s9  ;;  %p367_p3 = pneg %p548_p13 }
  0x17   : > { %s370_s17 = scalar_lea.hbm %s631_s0, 256  ;;  %p371_p5 = scmp.lt.s32.totalorder %s544_s4, %s631_s0 }
  0x18   : > { %p368_p4 = pnand %p367_p3, %p366_p2  ;;  %p372_p8 = scmp.lt.s32.totalorder %s370_s17, %s365_s9 }
  0x1a   : > { %p369_p7 = pneg %p368_p4  ;;  %p373_p10 = por %p372_p8, %p371_p5 }
  0x1c   : > { %p374_p9 = pnand %p373_p10, %p369_p7 }
  0x1e   : > { %377 = shalt.err (!%p374_p9)
}
  0x1f   : > { %s378_s22 = scalar_lea.vmem %s552_s6, 128  ;;  %s459_s26 = smov [#allocation2]  }
  0x20   : > { %p379_p0 = scmp.ne.s32.totalorder %s552_s6, %s378_s22  ;;  %s383_s27 = sshll.u32 %s459_s26, 4  ;;  %s384_s27 = int_to_ptr.vmem [resolvable:$false] %s383_s27 }
  0x21   : > { %s385_s28 = scalar_lea.vmem %s384_s27, 256  ;;  %p386_p4 = scmp.lt.s32.totalorder %s552_s6, %s384_s27 }
  0x22   : > { %p381_p1 = pnand %p379_p0, %p367_p3  ;;  %p387_p12 = scmp.lt.s32.totalorder %s385_s28, %s378_s22 }
  0x24   : > { %p382_p2 = pneg %p381_p1  ;;  %p388_p11 = por %p387_p12, %p386_p4 }
  0x26   : > { %p389_p6 = pnand %p388_p11, %p382_p2 }
  0x28   : > { %392 = shalt.err (!%p389_p6)
}
  0x29   : > { %324 = dma.hbm_to_vmem [thread:$0]  (!%p548_p13), %s544_s4, 128, %s552_s6, %s138_s8  }
  0x2a   : > { %p642_p9 = scmp.lt.s32.totalorder %s457_s15, 3  ;;  %p643_p7 = scmp.ge.s32.totalorder %s457_s15, 1 }
  0x2c   : > { %p154_p0 = pnand %p643_p7, %p642_p9 }
  0x2d   : > { %s579_s29 = sand.u32 (!%p154_p0), 1, %s449_s13   ;;  %p644_p6 = scmp.ne.s32.totalorder (!%p154_p0), %s638_s23, 0 }
  0x2e   : > { %157 = sbr.rel (%p154_p0) target bundleno = 374 (0x176), region = 32  ;;  %s309_s30 = sshll.u32 (!%p154_p0), %s579_s29, 3 }
  0x2f   : > { %s160_s5 = scalar_lea.sflag (!%p154_p0), [#allocation3], %s579_s29  ;;  %s163_s9 = scalar_lea.vmem (!%p154_p0), [#allocation2], %s309_s30 }
  0x33   : > { %436 = dma.done.wait (%p644_p6), %s160_s5, 128  }
  0x34   : > { %438 = vsyncadd (%p644_p6), %s160_s5, 4294967168  ;;  %vm187_vm0 = vcmask 261120   ;;  %v186_v0 = vld [vmem:[%s163_s9] sm:$0xff]  ;;  %s314_s8 = sshll.u32 %s502_s16, 7  ;;  %s185_s10 = scalar_lea.vmem [#allocation5], %s309_s30 }
  0x35   : > { %v188_v1 = vsel %vm187_vm0, %v186_v0, 0.0  ;;  %v311_v11 = vld [vmem:[%s632_s1] ss:$0 sm:$0xff]  ;;  %s233_s11 = sshll.u32 %s185_s10, 4  ;;  %s231_s20 = scalar_lea.hbm %s634_s3, %s314_s8  ;;  %s234_s11 = int_to_ptr.vmem [resolvable:$true] %s233_s11 }
  0x36   : > { %189 = vadd.xlane.f32.xlu0 %v188_v1  ;;  %v312_v13 = vld [vmem:[%s633_s2] ss:$0 sm:$0xff]  ;;  %s220_s22 = scalar_lea.sflag [#allocation4], %s579_s29  ;;  %s393_s26 = scalar_lea.vmem %s234_s11, 128 }
  0x37   : > { %p394_p11 = scmp.ne.s32.totalorder %s234_s11, %s393_s26  ;;  %p645_p12 = scmp.ne.s32.totalorder %s639_s24, 0 }
  0x38   : > { %s460_s27 = smov [#allocation5]  }
  0x39   : > { %p395_p13 = pnand %p394_p11, %p645_p12  ;;  %s397_s28 = sshll.u32 %s460_s27, 4  ;;  %s398_s28 = int_to_ptr.vmem [resolvable:$false] %s397_s28 }
  0x3a   : > { %s399_s16 = scalar_lea.vmem %s398_s28, 256  ;;  %p400_p3 = scmp.lt.s32.totalorder %s234_s11, %s398_s28 }
  0x3b   : > { %p396_p1 = pneg %p395_p13  ;;  %p401_p5 = scmp.lt.s32.totalorder %s399_s16, %s393_s26 }
  0x3d   : > { %p402_p8 = por %p401_p5, %p400_p3 }
  0x3f   : > { %p403_p10 = pnand %p402_p8, %p396_p1 }
  0xbf   : > { %v190_v2 = vpop.xlane.xlu0 %189 }
  0xc0   : > { %v192_v3 = vmul.f32 0.03125, %v190_v2 }
  0xc2   : > { %v193_v4 = vsub.f32 %v186_v0, %v192_v3 }
  0xc4   : > { %v194_v5 = vmul.f32 %v193_v4, %v193_v4 }
  0xc6   : > { %v195_v6 = vsel %vm187_vm0, %v194_v5, 0.0 }
  0xc7   : > { %196 = vadd.xlane.f32.xlu0 %v195_v6 }
 0x150   : > { %v197_v7 = vpop.xlane.xlu0 %196 }
 0x151   : > { %v198_v8 = vmul.f32 0.03125, %v197_v7 }
 0x153   : > { %v199_v9 = vadd.f32 1e-05, %v198_v8 }
 0x155   : > { %363 = vrsqrt.f32 %v199_v9 }
 0x162   : > { %v364_v10 = vpop.eup %363 }
 0x163   : > { %v201_v12 = vmul.f32 %v364_v10, %v193_v4 }
 0x165   : > { %v209_v14 = vmul.f32 %v311_v11, %v201_v12 }
 0x167   : > { %v217_v15 = vadd.f32 %v312_v13, %v209_v14 }
 0x169   : > { %218 = vst.msk [vmem:[%s185_s10] sm:$0xff] %vm187_vm0, %v217_v15 }
 0x16a   : > { %406 = shalt.err (!%p403_p10)
}
 0x16b   : > { %s407_s30 = scalar_lea.hbm %s231_s20, 128  ;;  %s411_s9 = scalar_lea.hbm %s634_s3, 256 }
 0x16c   : > { %p408_p2 = scmp.ne.s32.totalorder %s231_s20, %s407_s30  ;;  %p412_p7 = scmp.lt.s32.totalorder %s231_s20, %s634_s3 }
 0x16d   : > { %p413_p0 = scmp.lt.s32.totalorder %s411_s9, %s407_s30 }
 0x16e   : > { %p409_p4 = pnand %p408_p2, %p645_p12 }
 0x16f   : > { %p414_p6 = por %p413_p0, %p412_p7 }
 0x170   : > { %p410_p9 = pneg %p409_p4 }
 0x172   : > { %p415_p11 = pnand %p414_p6, %p410_p9 }
 0x174   : > { %418 = shalt.err (!%p415_p11)
}
 0x175   : > { %319 = dma.vmem_to_hbm [thread:$0]  (%p645_p12), %s234_s11, 128, %s231_s20, %s220_s22  }
 0x176 PF: > { %s245_s6 = sand.u32 1, %s445_s12   ;;  %p646_p13 = scmp.ne.s32.totalorder %s640_s25, 0 }
 0x177   : > { %p647_p1 = scmp.ge.s32.totalorder %s457_s15, 2  ;;  %s246_s7 = scalar_lea.sflag [#allocation4], %s245_s6 }
 0x179   : > { %p326_p3 = pnand %p647_p1, %p646_p13 }
 0x17b   : > { %p327_p5 = pneg %p326_p3 }
 0x17d   : > { %440 = dma.done.wait (%p327_p5), %s246_s7, 128  }
 0x17e   : > { %442 = vsyncadd (%p327_p5), %s246_s7, 4294967168  ;;  %p16_p8 = scmp.ge.s32.totalorder %s506_s18, 4   ;;  %s648_s12 = smov %s449_s13 }
 0x17f   : > { %s649_s13 = smov %s453_s14  ;;  %s650_s14 = smov %s518_s21 }
 0x180   : > { %s651_s15 = smov %s506_s18  ;;  %18 = sbr.rel (!%p16_p8) target bundleno = 5 (0x5), region = 77 }
 0x185   :  { %251 = vsyncpa [#allocation3], 1 }
 0x186   :  { %253 = vsyncpa [#allocation3 + $0x1], 1 }
 0x187   :  { %254 = vsyncpa [#allocation4], 1 }
 0x188   :  { %256 = vsyncpa [#allocation4 + $0x1], 1 }

</bundles_post_ra>
